<compile_context>
chip_gen: v5e
topology: v5e:2x2
jax: 0.10.0
libtpu: 0.0.40
codegen_flags: <defaults>
</compile_context>

<pallas_src>
import functools

import jax
import jax.numpy as jnp
from jax.experimental import pallas as pl
from jax.experimental.pallas import tpu as pltpu


def _attention_kernel(x_ref, w_ref, o_ref, *, key_ch, out_ch, block_b,
                      approx_recip):
    # x_ref: (block_b, C_in, T)   NCL input block (MXU dtype)
    # w_ref: (2*key+out, C_in)    fused [Wq; Wk; Wv] (MXU dtype)
    # o_ref: (block_b, out_ch, T) NCL output block
    w = w_ref[...]
    mxu_dtype = w.dtype

    for bb in range(block_b):                       # small static unroll
        x = x_ref[bb]                               # (C_in, T)

        # Fused Q/K/V projection: one MXU matmul, f32 accumulation.
        qkv = jnp.dot(w, x, preferred_element_type=jnp.float32)     # (N, T)
        q = qkv[:key_ch, :]                         # (key, T)
        k = qkv[key_ch:2 * key_ch, :]               # (key, T)
        v = qkv[2 * key_ch:, :]                     # (out, T)

        # Scores S = Q^T K -> (T, T).  Only the small (key, T) q tile is
        # transposed; k is consumed untransposed.
        s = jnp.dot(q.T.astype(mxu_dtype), k.astype(mxu_dtype),
                    preferred_element_type=jnp.float32)             # (T, T)

        # Row softmax in f32 (axis=2 of the PyTorch (B, T, T) attention mat).
        s = s - jnp.max(s, axis=-1, keepdims=True)
        p = jnp.exp(s)
        p = p * pl.reciprocal(jnp.sum(p, axis=-1, keepdims=True),
                              approx=approx_recip)

        # NCL output y = V @ P^T -> (out, T): transpose-RHS dot, no
        # materialized transpose of the (T, T) probability matrix.
        o = jax.lax.dot_general(
            v.astype(mxu_dtype), p.astype(mxu_dtype),
            dimension_numbers=(((1,), (1,)), ((), ())),
            preferred_element_type=jnp.float32)                     # (out, T)
        o_ref[bb] = o.astype(o_ref.dtype)


def _choose_tiling(B, C_in, T, n_proj, out_ch, in_itemsize):
    """Pick batch-block size and a VMEM budget with headroom."""
    per_elem = (2 * in_itemsize * C_in * T          # x block (double-buffered)
                + 2 * 4 * out_ch * T                # out block (double-buffered)
                + 4 * (n_proj * T + 3 * T * T + out_ch * T))  # f32 intermediates
    budget = 24 << 20                               # headroom vs v7x 64 MiB VMEM
    bb = max(1, budget // max(per_elem, 1))
    if B >= 2:
        bb = min(bb, B // 2)   # keep >= 2 grid steps so both v7x TCs get work
    bb = int(max(1, min(bb, B)))
    while B % bb:              # block size must evenly divide the batch
        bb -= 1
    w_bytes = 2 * in_itemsize * n_proj * C_in
    est = bb * per_elem + w_bytes
    vmem_limit = int(min(max(4 * est, 8 << 20), 48 << 20))
    return bb, vmem_limit


def attention_layer(x_ncl, w_q, w_k, w_v, *, block_b=None,
                    use_bf16_mxu=True, approx_recip=True):
    """x_ncl: (B, C_in, T); w_*: (out_ch, in_ch) 1x1-conv weights (bias=False).

    Returns (B, out_channels, T), matching AttentionLayer.forward.
    """
    B, C_in, T = x_ncl.shape
    key_ch = w_q.shape[0]
    out_ch = w_v.shape[0]
    assert w_q.shape == (key_ch, C_in) and w_k.shape == (key_ch, C_in)
    assert w_v.shape == (out_ch, C_in)
    n_proj = 2 * key_ch + out_ch

    # Fuse [Wq; Wk; Wv] -> one projection matmul and one weight DMA per step.
    w_fused = jnp.concatenate([w_q, w_k, w_v], axis=0)          # (n_proj, C_in)

    # bf16 MXU operands (f32 accumulation / f32 softmax) pays off on v6e/v7x;
    # on v5e the kernel is layout/overhead-bound so it is harmless.
    mxu_dtype = jnp.bfloat16 if use_bf16_mxu else x_ncl.dtype
    x_in = x_ncl.astype(mxu_dtype)
    w_in = w_fused.astype(mxu_dtype)

    auto_bb, vmem_limit = _choose_tiling(B, C_in, T, n_proj, out_ch,
                                         jnp.dtype(mxu_dtype).itemsize)
    if block_b is None:
        block_b = auto_bb
    assert B % block_b == 0

    kernel = functools.partial(_attention_kernel, key_ch=key_ch, out_ch=out_ch,
                               block_b=block_b, approx_recip=approx_recip)

    # TODO(synk): for very large T (4*T^2 bytes approaching v7x's 64 MiB VMEM),
    # switch the in-kernel softmax to flash-style tiling over the key/time axis.
    return pl.pallas_call(
        kernel,
        out_shape=jax.ShapeDtypeStruct((B, out_ch, T), x_ncl.dtype),
        grid_spec=pltpu.PrefetchScalarGridSpec(
            num_scalar_prefetch=0,
            grid=(B // block_b,),
            in_specs=[
                pl.BlockSpec((block_b, C_in, T), lambda b: (b, 0, 0)),
                pl.BlockSpec((n_proj, C_in), lambda b: (0, 0)),
            ],
            out_specs=pl.BlockSpec((block_b, out_ch, T), lambda b: (b, 0, 0)),
        ),
        compiler_params=pltpu.CompilerParams(
            dimension_semantics=("parallel",),
            vmem_limit_bytes=vmem_limit),
    )(x_in, w_in)


def _reference(x_ncl, w_q, w_k, w_v):
    # Pure-JAX replica of the PyTorch forward, for verification.
    Q = jnp.einsum('kc,bct->bkt', w_q, x_ncl)
    K = jnp.einsum('kc,bct->bkt', w_k, x_ncl)
    V = jnp.einsum('oc,bct->bot', w_v, x_ncl)
    A = jax.nn.softmax(jnp.einsum('bkt,bks->bts', Q, K), axis=2)
    y = jnp.einsum('bts,bos->bto', A, V)
    return jnp.transpose(y, (0, 2, 1))


if __name__ == "__main__":
    # Small shapes consistent with the module's forward.
    B, C_in, T = 2, 8, 16
    key_channels, out_channels = 16, 16

    root = jax.random.PRNGKey(0)
    kx, kq, kk, kv = jax.random.split(root, 4)

    x = jax.random.normal(kx, (B, C_in, T), dtype=jnp.float32)
    # Deterministic "conv" weights (1x1 Conv1d, bias=False) ~ kaiming-ish scale.
    scale = 1.0 / jnp.sqrt(jnp.float32(C_in))
    w_q = jax.random.normal(kq, (key_channels, C_in), dtype=jnp.float32) * scale
    w_k = jax.random.normal(kk, (key_channels, C_in), dtype=jnp.float32) * scale
    w_v = jax.random.normal(kv, (out_channels, C_in), dtype=jnp.float32) * scale

    y_ref = _reference(x, w_q, w_k, w_v)

    # Precise path: f32 MXU operands, exact reciprocal -> tight tolerance.
    y_f32 = jax.block_until_ready(
        attention_layer(x, w_q, w_k, w_v, use_bf16_mxu=False, approx_recip=False))
    assert y_f32.shape == (B, out_channels, T)
    assert jnp.allclose(y_f32, y_ref, atol=1e-5, rtol=1e-5), "f32 path mismatch"

    # Fast (default) path: bf16 MXU operands, f32 accumulate/softmax, approx recip.
    y_fast = jax.block_until_ready(attention_layer(x, w_q, w_k, w_v))
    assert y_fast.shape == (B, out_channels, T)
    assert jnp.allclose(y_fast, y_ref, atol=5e-2, rtol=5e-2), "bf16 path mismatch"

    print("KERNEL_OK")
</pallas_src>

<mosaic_0001>
module attributes {stable_mosaic.version = 11 : i64} {
  func.func @_attention_kernel(%arg0: i32, %arg1: memref<1x8x16xf32, #tpu.memory_space<vmem>>, %arg2: memref<48x8xf32, #tpu.memory_space<vmem>>, %arg3: memref<1x16x16xf32, #tpu.memory_space<vmem>>) attributes {dimension_semantics = [#tpu.dimension_semantics<parallel>], iteration_bounds = array<i64: 2>, scalar_prefetch = 0 : i64, scratch_operands = 0 : i64, tpu.core_type = #tpu.core_type<tc>, window_params = [{transform_indices = @transform_0, window_bounds = array<i64: 1, 8, 16>}, {pipeline_mode = #tpu.pipeline_mode<synchronous>, transform_indices = @transform_1, window_bounds = array<i64: 48, 8>}, {transform_indices = @transform_2, window_bounds = array<i64: 1, 16, 16>}]} {
    %c0 = arith.constant 0 : index
    %c0_0 = arith.constant 0 : index
    %0 = vector.load %arg2[%c0, %c0_0] : memref<48x8xf32, #tpu.memory_space<vmem>>, vector<48x8xf32>
    %c0_1 = arith.constant 0 : index
    %c0_2 = arith.constant 0 : index
    %c0_3 = arith.constant 0 : index
    %1 = vector.load %arg1[%c0_1, %c0_2, %c0_3] : memref<1x8x16xf32, #tpu.memory_space<vmem>>, vector<1x8x16xf32>
    %2 = vector.shape_cast %1 : vector<1x8x16xf32> to vector<8x16xf32>
    %cst = arith.constant dense<0.000000e+00> : vector<48x16xf32>
    %3 = tpu.matmul %0, %2, %cst {dimension_numbers = #tpu.dot_dimension_numbers<[1], [0], [0], [1], [0, 0, 1, 1], [], []>} : vector<48x8xf32>, vector<8x16xf32>, vector<48x16xf32> -> vector<48x16xf32>
    %4 = vector.extract_strided_slice %3 {offsets = [0, 0], sizes = [16, 16], strides = [1, 1]} : vector<48x16xf32> to vector<16x16xf32>
    %5 = vector.extract_strided_slice %3 {offsets = [16, 0], sizes = [16, 16], strides = [1, 1]} : vector<48x16xf32> to vector<16x16xf32>
    %6 = vector.extract_strided_slice %3 {offsets = [32, 0], sizes = [16, 16], strides = [1, 1]} : vector<48x16xf32> to vector<16x16xf32>
    %7 = tpu.transpose %4, [1, 0] : vector<16x16xf32> -> vector<16x16xf32>
    %cst_4 = arith.constant dense<0.000000e+00> : vector<16x16xf32>
    %8 = tpu.matmul %7, %5, %cst_4 {dimension_numbers = #tpu.dot_dimension_numbers<[1], [0], [0], [1], [0, 0, 1, 1], [], []>} : vector<16x16xf32>, vector<16x16xf32>, vector<16x16xf32> -> vector<16x16xf32>
    %cst_5 = arith.constant dense<0xFF800000> : vector<16xf32>
    %9 = vector.multi_reduction <maximumf>, %8, %cst_5 [1] : vector<16x16xf32> to vector<16xf32>
    %10 = vector.shape_cast %9 : vector<16xf32> to vector<16x1xf32>
    %11 = vector.broadcast %10 : vector<16x1xf32> to vector<16x16xf32>
    %12 = arith.subf %8, %11 : vector<16x16xf32>
    %13 = math.exp %12 : vector<16x16xf32>
    %cst_6 = arith.constant dense<0.000000e+00> : vector<16xf32>
    %14 = vector.multi_reduction <add>, %13, %cst_6 [1] : vector<16x16xf32> to vector<16xf32>
    %15 = vector.shape_cast %14 : vector<16xf32> to vector<16x1xf32>
    %16 = tpu.reciprocal %15 : vector<16x1xf32> -> vector<16x1xf32>
    %17 = vector.broadcast %16 : vector<16x1xf32> to vector<16x16xf32>
    %18 = arith.mulf %13, %17 : vector<16x16xf32>
    %cst_7 = arith.constant dense<0.000000e+00> : vector<16x16xf32>
    %19 = tpu.matmul %6, %18, %cst_7 {dimension_numbers = #tpu.dot_dimension_numbers<[1], [1], [0], [0], [0, 0, 1, 0], [], []>} : vector<16x16xf32>, vector<16x16xf32>, vector<16x16xf32> -> vector<16x16xf32>
    %c0_8 = arith.constant 0 : index
    %c0_9 = arith.constant 0 : index
    %c0_10 = arith.constant 0 : index
    %20 = vector.load %arg3[%c0_8, %c0_9, %c0_10] : memref<1x16x16xf32, #tpu.memory_space<vmem>>, vector<1x16x16xf32>
    %21 = vector.shape_cast %20 : vector<1x16x16xf32> to vector<16x16xf32>
    %22 = vector.shape_cast %19 : vector<16x16xf32> to vector<1x16x16xf32>
    tpu.vector_store %arg3[%c0_8, %c0_9, %c0_10], %22 {strides = array<i32>} : memref<1x16x16xf32, #tpu.memory_space<vmem>>, vector<1x16x16xf32>,
    return
  }
  func.func @transform_0(%arg0: i32) -> (i32, i32, i32) {
    %c0_i32 = arith.constant 0 : i32
    %c0_i32_0 = arith.constant 0 : i32
    %c0_i32_1 = arith.constant 0 : i32
    return %arg0, %c0_i32, %c0_i32_0 : i32, i32, i32
  }
  func.func @transform_1(%arg0: i32) -> (i32, i32) {
    %c0_i32 = arith.constant 0 : i32
    %c0_i32_0 = arith.constant 0 : i32
    %c0_i32_1 = arith.constant 0 : i32
    return %c0_i32, %c0_i32_0 : i32, i32
  }
  func.func @transform_2(%arg0: i32) -> (i32, i32, i32) {
    %c0_i32 = arith.constant 0 : i32
    %c0_i32_0 = arith.constant 0 : i32
    %c0_i32_1 = arith.constant 0 : i32
    return %arg0, %c0_i32, %c0_i32_0 : i32, i32, i32
  }
}

</mosaic_0001>

<bundles_post_ra>
// kernel: tpu_custom_call.1
= control target key start
LH: loop header
LB: loop body
LE: loop exit
PB: predicated region body
PF: predicated region fallthrough
CT: control target
= control target key end

     0   :  { %7 = vsyncpa [#allocation3], 0  ;;  %s702_s0 = inlined_call_operand.vmem [shape: f32[2,8,16], index: 0, kind: input, shape index: {}]   ;;  %s703_s1 = inlined_call_operand.vmem [shape: f32[48,8], index: 1, kind: input, shape index: {}]   ;;  %s704_s2 = inlined_call_operand.hbm [shape: f32[2,16,16], index: 2, kind: output, shape index: {}]  }
   0x1   :  { %9 = vsyncpa [#allocation3 + $0x1], 0  ;;  %s581_s9 = smov 0   ;;  %s583_s10 = smov 0  }
   0x2   :  { %s585_s11 = smov 0   ;;  %s587_s12 = smov 0  }
   0x3 LB: > { %s602_s13 = sadd.s32 4294967295, %s562_s12   ;;  %s425_s14 = sadd.s32 4294967294, %s562_s12   ;;  %s562_s12 = sphi %s587_s12, %s710_s12   ;;  %s558_s11 = sphi %s585_s11, %s709_s11   ;;  %s554_s10 = sphi %s583_s10, %s708_s10   ;;  %s550_s9 = sphi %s581_s9, %s707_s9  }
   0x4   : > { %s606_s15 = sadd.s32 1, %s562_s12   ;;  %s69_s16 = sadd.s32 1, %s558_s11 }
   0x5   : > { %s66_s17 = ssub.s32 %s562_s12, %s606_s15  ;;  %p79_p0 = scmp.ne.s32.totalorder %s558_s11, %s554_s10 }
   0x6   : > { %p67_p1 = scmp.eq.s32.totalorder %s66_s17, 0  ;;  %p80_p2 = scmp.eq.s32.totalorder %s602_s13, 1 }
   0x7   : > { %p85_p3 = scmp.ne.s32.totalorder %s554_s10, %s550_s9  ;;  %p86_p4 = scmp.eq.s32.totalorder %s425_s14, 1 }
   0x8   : > { %s617_s18 = scalar_select %p67_p1, %s558_s11, %s69_s16  }
   0x9   : > { %p619_p5 = por %p80_p2, %p79_p0  ;;  %p623_p6 = por %p86_p4, %p85_p3 }
   0xa   : > { %p428_p7 = scmp.ge.s32.totalorder %s562_s12, 1  ;;  %p114_p8 = scmp.lt.s32.totalorder %s562_s12, 3 }
   0xc   : > { %p115_p9 = pnand %p428_p7, %p114_p8 }
   0xd   : > { %p135_p10 = scmp.lt.s32.totalorder (!%p115_p9), %s602_s13, 1  ;;  %s132_s16 = sand.u32 (!%p115_p9), 1, %s554_s10  }
   0xe   : > { %118 = sbr.rel (%p115_p9) target bundleno = 869 (0x365), region = 28  ;;  %s429_s17 = sshll.u32 (!%p115_p9), %s132_s16, 4 }
   0xf   : > { %s348_s28 = scalar_lea.sflag (!%p115_p9), [#allocation3], %s132_s16  ;;  %s520_s4 = scalar_lea.hbm (!%p115_p9), %s704_s2, 32 }
  0x13   : > { %s136_s21 = scalar_select %p135_p10, %s602_s13, 1  ;;  %v139_v0 = vld [vmem:[%s703_s1] sm:$0xff]  ;;  %vm146_vm0 = vcmask 64512   ;;  %v140_v2 = vld [vmem:[%s703_s1 + $0x8] sm:$0xff]  ;;  %v142_v3 = vld [vmem:[%s703_s1 + $0x18] sm:$0xff]  ;;  %vm232_vm1 = vcmask 130048  }
  0x14   : > { %v141_v4 = vld [vmem:[%s703_s1 + $0x10] sm:$0xff]  ;;  %v143_v15 = vld [vmem:[%s703_s1 + $0x20] sm:$0xff]  ;;  %v144_v16 = vld [vmem:[%s703_s1 + $0x28] sm:$0xff] }
  0x15   : > { %s430_s22 = sshll.u32 %s136_s21, 3  ;;  %s448_s21 = sshll.u32 %s602_s13, 4 }
  0x16   : > { %s138_s25 = scalar_lea.vmem %s702_s0, %s430_s22  ;;  %s359_s24 = scalar_lea.hbm %s704_s2, %s448_s21 }
  0x17   : > { %v145_v1 = vld [vmem:[%s138_s25] sm:$0xff]  ;;  %s134_s25 = scalar_lea.vmem [#allocation2], %s429_s17  ;;  %s362_s27 = sshll.u32 %s359_s24, 4  ;;  %s363_s27 = int_to_ptr.hbm [resolvable:$true] %s362_s27 }
  0x18   : > { %180 = vmatpush.msra.mxu0 %v145_v1  ;;  %449 = vmatpush.msra.mxu3 %v145_v1  ;;  %s360_s26 = sshll.u32 %s134_s25, 4  ;;  %s514_s29 = sshra.s32 %s363_s27, 4  ;;  %s361_s26 = int_to_ptr.vmem [resolvable:$true] %s360_s26  ;;  %s515_s29 = int_to_ptr.hbm [resolvable:$true] %s514_s29 }
  0x19   : > { %431 = vmatmul.msk.f32.vlgmr.msra.gmra.mxu0 %vm146_vm0, %v139_v0  ;;  %434 = vmatmul.msk.f32.vlgmr.msra.gmra.mxu3 %vm146_vm0, %v142_v3  ;;  %s516_s13 = scalar_lea.hbm %s515_s29, 16  ;;  %p521_p0 = scmp.lt.s32.totalorder %s515_s29, %s704_s2 }
  0x1a   : > { %p517_p11 = scmp.ne.s32.totalorder %s515_s29, %s516_s13  ;;  %p522_p1 = scmp.lt.s32.totalorder %s520_s4, %s516_s13 }
  0x1c   : > { %p518_p12 = pnand %p517_p11, %p619_p5  ;;  %p523_p2 = por %p522_p1, %p521_p0 }
  0x1e   : > { %p519_p13 = pneg %p518_p12 }
  0x20   : > { %p524_p3 = pnand %p523_p2, %p519_p13 }
  0x21   : > { %432 = vmatmul.msk.f32.gmra.mxu0 %vm146_vm0, %v140_v2  ;;  %435 = vmatmul.msk.f32.gmra.mxu3 %vm146_vm0, %v143_v15 }
  0x29   : > { %433 = vmatmul.msk.f32.gmra.mxu0 %vm146_vm0, %v141_v4  ;;  %436 = vmatmul.msk.f32.gmra.mxu3 %vm146_vm0, %v144_v16 }
  0x96   : > { %v182_v5 = vpop.f32.mrf.mxu0 }
  0x97   : > { %200 = vxpose.xlu0.b32.start [1/2] (short) (narrow) %v182_v5, 16 }
  0x9c   : > { %v191_v7 = vpop.f32.mrf.mxu3 }
  0x9d   : > { %253 = vmatpush.msra.mxu1 %v191_v7 }
  0x9e   : > { %v185_v6 = vpop.f32.mrf.mxu0 }
  0x9f   : > { %201 = vxpose.xlu0.b32.end [2/2] (short) (narrow) %v185_v6, 16 }
  0xa4   : > { %v194_v51 = vpop.f32.mrf.mxu3 }
  0xa6   : > { %v188_v8 = vpop.f32.mrf.mxu0 }
  0xa7   : > { %254 = vmatpush.msra.mxu1 %v188_v8 }
  0xac   : > { %v197_v52 = vpop.f32.mrf.mxu3 }
 0x13b   : > { %v216_v9 = vpop.trf.xlu0 }
 0x13c   : > { %437 = vmatmul.msk.f32.vlgmr.msra.gmra.mxu1 %vm232_vm1, %v216_v9 }
 0x143   : > { %v217_v10 = vpop.trf.xlu0 }
 0x144   : > { %438 = vmatmul.msk.f32.gmra.mxu1 %vm232_vm1, %v217_v10 }
 0x1b9   : > { %v256_v11 = vpop.f32.mrf.mxu1 }
 0x1ba   : > { %v262_v14 = vsel %vm232_vm1, %v256_v11, -inf }
 0x1c1   : > { %v259_v12 = vpop.f32.mrf.mxu1 }
 0x1c2   : > { %v265_v13 = vsel %vm232_vm1, %v259_v12, -inf }
 0x1c3   : > { %266 = vmax.xlane.f32.xlu1 %v265_v13 }
 0x1cb   : > { %263 = vmax.xlane.f32.xlu1 %v262_v14 }
 0x236   : > { %v267_v17 = vpop.xlane.xlu1 %266 }
 0x237   : > { %v269_v18 = vsub.f32 %v259_v12, %v267_v17 }
 0x239   : > { %v272_v19 = vmul.f32 1.442695, %v269_v18 }
 0x23b   : > { %492 = vpow2.f32 %v272_v19 }
 0x23e   : > { %v264_v20 = vpop.xlane.xlu1 %263 }
 0x23f   : > { %v268_v21 = vsub.f32 %v256_v11, %v264_v20 }
 0x241   : > { %v493_v22 = vpop.eup %492  ;;  %v270_v23 = vmul.f32 1.442695, %v268_v21 }
 0x242   : > { %v277_v24 = vsel %vm232_vm1, %v493_v22, 0.0 }
 0x243   : > { %494 = vpow2.f32 %v270_v23  ;;  %278 = vadd.xlane.f32.xlu2 %v277_v24 }
 0x249   : > { %v495_v25 = vpop.eup %494 }
 0x24a   : > { %v274_v26 = vsel %vm232_vm1, %v495_v25, 0.0 }
 0x24b   : > { %275 = vadd.xlane.f32.xlu2 %v274_v26 }
 0x2b6   : > { %v279_v27 = vpop.xlane.xlu2 %278 }
 0x2b7   : > { %496 = vrcp.f32 %v279_v27  ;;  %v305_v32 = vand.u32 2147483648, %v279_v27  ;;  %v303_v34 = vand.u32 2147483647, %v279_v27  ;;  %vm299_vm3 = vweird.f32 %v279_v27 }
 0x2b9   : > { %v306_v37 = vor.u32 1.1754944e-38, %v305_v32  ;;  %vm304_vm5 = vcmp.eq.f32.partialorder %v303_v34, 8.507059e+37 }
 0x2bd   : > { %v497_v28 = vpop.eup %496 }
 0x2be   : > { %v295_v29 = vmul.f32 %v497_v28, %v279_v27  ;;  %v276_v30 = vpop.xlane.xlu2 %275  ;;  %vm300_vm2 = vweird.f32 %v497_v28 }
 0x2bf   : > { %498 = vrcp.f32 %v276_v30  ;;  %vm301_vm4 = vmor %vm299_vm3, %vm300_vm2  ;;  %v291_v43 = vand.u32 2147483648, %v276_v30  ;;  %v289_v45 = vand.u32 2147483647, %v276_v30  ;;  %vm285_vm7 = vweird.f32 %v276_v30 }
 0x2c0   : > { %v296_v31 = vsub.f32 1.0, %v295_v29 }
 0x2c1   : > { %v292_v47 = vor.u32 1.1754944e-38, %v291_v43  ;;  %vm290_vm9 = vcmp.eq.f32.partialorder %v289_v45, 8.507059e+37 }
 0x2c2   : > { %v297_v33 = vmul.f32 %v497_v28, %v296_v31 }
 0x2c4   : > { %v298_v35 = vadd.f32 %v497_v28, %v297_v33 }
 0x2c5   : > { %v499_v36 = vpop.eup %498 }
 0x2c6   : > { %v281_v38 = vmul.f32 %v499_v36, %v276_v30  ;;  %v302_v39 = vsel %vm301_vm4, %v497_v28, %v298_v35  ;;  %vm286_vm6 = vweird.f32 %v499_v36 }
 0x2c7   : > { %v307_v40 = vsel %vm304_vm5, %v306_v37, %v302_v39  ;;  %vm287_vm8 = vmor %vm285_vm7, %vm286_vm6 }
 0x2c8   : > { %v282_v41 = vsub.f32 1.0, %v281_v38  ;;  %v309_v42 = vmul.f32 %v493_v22, %v307_v40 }
 0x2ca   : > { %v283_v44 = vmul.f32 %v499_v36, %v282_v41  ;;  %439 = vmatpush.xpose.msk.msra.mxu2 %vm232_vm1, %v309_v42 }
 0x2cc   : > { %v284_v46 = vadd.f32 %v499_v36, %v283_v44 }
 0x2ce   : > { %v288_v48 = vsel %vm287_vm8, %v499_v36, %v284_v46 }
 0x2cf   : > { %v293_v49 = vsel %vm290_vm9, %v292_v47, %v288_v48 }
 0x2d0   : > { %v308_v50 = vmul.f32 %v495_v25, %v293_v49 }
 0x2d2   : > { %440 = vmatpush.xpose.msk.msra.mxu2 %vm232_vm1, %v308_v50 }
 0x2d5   : > { %441 = vmatmul.msk.f32.vlgmr.msra.gmra.mxu2 %vm232_vm1, %v194_v51 }
 0x2dd   : > { %442 = vmatmul.msk.f32.gmra.mxu2 %vm232_vm1, %v197_v52 }
 0x358   : > { %v339_v53 = vpop.f32.mrf.mxu2 }
 0x359   : > { %345 = vst.msk [vmem:[%s134_s25] sm:$0xff] %vm232_vm1, %v339_v53 }
 0x360   : > { %v342_v54 = vpop.f32.mrf.mxu2 }
 0x361   : > { %346 = vst.msk [vmem:[%s134_s25 + $0x8] sm:$0xff] %vm232_vm1, %v342_v54 }
 0x362   : > { %527 = shalt.err (!%p524_p3)
}
 0x363   : > { %s564_s7 = smov 128   ;;  %s565_s8 = smov 8  }
 0x364   : > { %450 = dma.vmem_to_hbm [thread:$0]  (%p619_p5), %s361_s26, 256, %s363_s27, %s348_s28, %s564_s7, %s564_s7, %s565_s8  }
 0x365 PF: > { %p456_p4 = scmp.ge.s32.totalorder %s562_s12, 2  ;;  %s377_s14 = sand.u32 1, %s550_s9  }
 0x366   : > { %s378_s16 = scalar_lea.sflag [#allocation3], %s377_s14 }
 0x367   : > { %p453_p7 = pnand %p456_p4, %p623_p6 }
 0x369   : > { %p454_p8 = pneg %p453_p7 }
 0x36b   : > { %545 = dma.done.wait (%p454_p8), %s378_s16, 256  }
 0x36c   : > { %547 = vsyncadd (%p454_p8), %s378_s16, 4294967040  ;;  %p12_p9 = scmp.ge.s32.totalorder %s606_s15, 4   ;;  %s707_s9 = smov %s554_s10 }
 0x36d   : > { %s708_s10 = smov %s558_s11  ;;  %s709_s11 = smov %s617_s18 }
 0x36e   : > { %s710_s12 = smov %s606_s15  ;;  %14 = sbr.rel (!%p12_p9) target bundleno = 3 (0x3), region = 63 }
 0x373   :  { %384 = vsyncpa [#allocation3], 1 }
 0x374   :  { %386 = vsyncpa [#allocation3 + $0x1], 1 }

</bundles_post_ra>
